<compile_context>
chip_gen: v7x
topology: tpu7x:2x2x1
jax: 0.10.0
libtpu: 0.0.40
codegen_flags: <defaults>
</compile_context>

<pallas_src>
import functools
import math

import jax
import jax.numpy as jnp
from jax.experimental import pallas as pl
from jax.experimental.pallas import tpu as pltpu


def _gelu_exact(x):
    # nn.GELU() default is the exact (erf) formulation.
    return 0.5 * x * (1.0 + jax.lax.erf(x * (1.0 / math.sqrt(2.0))))


def _biattn_tile_kernel(x_ref, wl_ref, bl_ref, wsl_ref, c_ref, sg_ref, o_ref):
    """Local branch + gating for one (sample, HW-tile) grid point.

    x_ref   : (1, C, T)   input tile, NCHW layout (lane axis = spatial)
    wl_ref  : (Cr, C)     local_reduce 1x1-conv weight (out, in)
    bl_ref  : (Cr, 1)     local_reduce bias
    wsl_ref : (Cr, 1)     spatial_select weight rows acting on x_local
    c_ref   : (1, C, 1)   per-sample channel attention (sigmoid already applied)
    sg_ref  : (1, 1, 1)   per-sample scalar: x_global @ wsg + bs
    o_ref   : (1, C, T)   output tile
    """
    x = x_ref[0]                                              # (C, T)

    # x_local = GELU(local_reduce(x))  -> (Cr, T)  (f32 accumulate on MXU)
    xl = _gelu_exact(
        jnp.dot(wl_ref[...], x, preferred_element_type=jnp.float32)
        + bl_ref[...])

    # spatial gate: sigmoid(wsl . x_local + (wsg . x_global + bs))
    # VPU multiply + sublane reduce (no 1-wide MXU matmul).
    s_logits = jnp.sum(xl * wsl_ref[...], axis=0, keepdims=True) + sg_ref[0]
    s_attn = jax.nn.sigmoid(s_logits)                         # (1, T)

    # out = x * c_attn * s_attn  (c broadcasts over lanes, s over sublanes)
    o_ref[0] = (x * c_ref[0] * s_attn).astype(o_ref.dtype)


def _pick_tile_hw(hw, c, itemsize=4, vmem_budget_bytes=12 * 1024 * 1024):
    """Pick a lane-dense HW tile.

    Resident VMEM per step ~= 2 buffers x (input + output) x itemsize x C x T.
    Preference order:
      1. whole sample as one block (no HW grid axis) if it fits the budget,
      2. the largest multiple-of-128 tile <= cap that divides HW exactly
         (no masked partial-tile stores),
      3. the largest multiple-of-128 tile <= cap (partial last tile).
    """
    per_lane = 4 * itemsize * c
    max_t = max(128, vmem_budget_bytes // per_lane)
    if hw <= max_t:
        return hw                                  # full-extent block
    cap = min(max_t, 4096)
    cap = max(128, (cap // 128) * 128)
    for t in range(cap, 127, -128):
        if hw % t == 0:
            return t
    return cap


def biattn(x_nchw, params, *, tile_hw=None):
    """x_nchw: [B, C, H, W]. Returns [B, C, H, W]."""
    B, C, H, W = x_nchw.shape
    HW = H * W
    wg, bg, wl, bl, wc, bc, wsl, wsg, bs = params
    Cr = wg.shape[0]

    # NCHW -> (B, C, HW): free reshape, no transpose / extra HBM pass.
    x3 = x_nchw.reshape(B, C, HW)

    # ---- Pass 1 (tiny, plain JAX): global branch ----
    g = jnp.mean(x3.astype(jnp.float32), axis=2)               # (B, C)  avg-pool
    xg = jax.nn.gelu(g @ wg.T + bg, approximate=False)         # (B, Cr)
    c_attn = jax.nn.sigmoid(xg @ wc.T + bc)                    # (B, C)
    sg = xg @ wsg + bs                                         # (B,)

    c_attn3 = c_attn.reshape(B, C, 1).astype(jnp.float32)
    sg3 = sg.reshape(B, 1, 1).astype(jnp.float32)
    wl2 = wl.astype(jnp.float32)
    bl2 = bl.reshape(Cr, 1).astype(jnp.float32)
    wsl2 = wsl.reshape(Cr, 1).astype(jnp.float32)

    # ---- Pass 2 (Pallas): HW-tiled local branch + gating ----
    if tile_hw is None:
        tile_hw = _pick_tile_hw(HW, C, jnp.dtype(x_nchw.dtype).itemsize)
    grid = (B, pl.cdiv(HW, tile_hw))

    full = lambda shape: pl.BlockSpec(shape, lambda b, t: (0, 0))

    out = pl.pallas_call(
        _biattn_tile_kernel,
        out_shape=jax.ShapeDtypeStruct((B, C, HW), x_nchw.dtype),
        grid_spec=pltpu.PrefetchScalarGridSpec(
            num_scalar_prefetch=0,
            grid=grid,
            in_specs=[
                pl.BlockSpec((1, C, tile_hw), lambda b, t: (b, 0, t)),  # x tile
                full((Cr, C)),                                          # wl
                full((Cr, 1)),                                          # bl
                full((Cr, 1)),                                          # wsl
                pl.BlockSpec((1, C, 1), lambda b, t: (b, 0, 0)),        # c_attn
                pl.BlockSpec((1, 1, 1), lambda b, t: (b, 0, 0)),        # sg scalar
            ],
            out_specs=pl.BlockSpec((1, C, tile_hw), lambda b, t: (b, 0, t)),
        ),
        compiler_params=pltpu.CompilerParams(
            dimension_semantics=("parallel", "parallel")),
    )(x3, wl2, bl2, wsl2, c_attn3, sg3)

    # TODO(synk): optional bf16 I/O (cast at the pallas_call boundary) would
    # halve HBM traffic on v6e/v7x if the surrounding model tolerates it.
    return out.reshape(B, C, H, W)


def init_params(key, in_channels, act_ratio=0.25):
    """Deterministic synthetic parameters in PyTorch (out, in) conv layout.

    wg/wl: (Cr, C); wc: (C, Cr); spatial_select (1, 2*Cr) split into wsl (first
    Cr rows, acting on x_local) and wsg (last Cr rows, acting on x_global).
    """
    Cr = int(in_channels * act_ratio)
    ks = jax.random.split(key, 9)
    sc = 0.1
    wg = sc * jax.random.normal(ks[0], (Cr, in_channels), jnp.float32)
    bg = sc * jax.random.normal(ks[1], (Cr,), jnp.float32)
    wl = sc * jax.random.normal(ks[2], (Cr, in_channels), jnp.float32)
    bl = sc * jax.random.normal(ks[3], (Cr,), jnp.float32)
    wc = sc * jax.random.normal(ks[4], (in_channels, Cr), jnp.float32)
    bc = sc * jax.random.normal(ks[5], (in_channels,), jnp.float32)
    wsl = sc * jax.random.normal(ks[6], (Cr,), jnp.float32)
    wsg = sc * jax.random.normal(ks[7], (Cr,), jnp.float32)
    bs = sc * jax.random.normal(ks[8], (), jnp.float32)
    return (wg, bg, wl, bl, wc, bc, wsl, wsg, bs)


def biattn_ref(x_nchw, params):
    """Pure-JAX reference mirroring the PyTorch forward."""
    wg, bg, wl, bl, wc, bc, wsl, wsg, bs = params
    B, C, H, W = x_nchw.shape
    x = jnp.transpose(x_nchw, (0, 2, 3, 1)).reshape(B, H * W, C)     # [B,HW,C]
    g = jnp.mean(x, axis=1)                                          # [B,C]
    xg = jax.nn.gelu(g @ wg.T + bg, approximate=False)               # [B,Cr]
    xl = jax.nn.gelu(x @ wl.T + bl, approximate=False)               # [B,HW,Cr]
    c_attn = jax.nn.sigmoid(xg @ wc.T + bc)                          # [B,C]
    s_logits = xl @ wsl + (xg @ wsg)[:, None] + bs                   # [B,HW]
    s_attn = jax.nn.sigmoid(s_logits)                                # [B,HW]
    out = x * c_attn[:, None, :] * s_attn[:, :, None]                # [B,HW,C]
    return jnp.transpose(out.reshape(B, H, W, C), (0, 3, 1, 2))


if __name__ == "__main__":
    key = jax.random.PRNGKey(0)
    kx, kp = jax.random.split(key)

    B, C, H, W = 2, 16, 16, 16          # Cr = int(16 * 0.25) = 4, HW = 256
    x = jax.random.normal(kx, (B, C, H, W), jnp.float32)
    params = init_params(kp, C, act_ratio=0.25)
    ref = biattn_ref(x, params)

    # Explicit tile_hw=128 -> grid (2, 2): exercises both batch and HW-tile axes.
    run_tiled = jax.jit(functools.partial(biattn, tile_hw=128))
    out_tiled = jax.block_until_ready(run_tiled(x, params))
    assert out_tiled.shape == (B, C, H, W)
    assert jnp.allclose(out_tiled, ref, atol=2e-5, rtol=2e-5), "mismatch (tiled)"

    # Auto tile: whole sample fits VMEM -> one full-extent block per sample.
    run_auto = jax.jit(biattn)
    out_auto = jax.block_until_ready(run_auto(x, params))
    assert jnp.allclose(out_auto, ref, atol=2e-5, rtol=2e-5), "mismatch (auto)"

    print("KERNEL_OK")
</pallas_src>

<mosaic_0001>
module attributes {stable_mosaic.version = 11 : i64} {
  func.func @_biattn_tile_kernel(%arg0: i32, %arg1: i32, %arg2: memref<1x16x128xf32, #tpu.memory_space<vmem>>, %arg3: memref<4x16xf32, #tpu.memory_space<vmem>>, %arg4: memref<4x1xf32, #tpu.memory_space<vmem>>, %arg5: memref<4x1xf32, #tpu.memory_space<vmem>>, %arg6: memref<1x16x1xf32, #tpu.memory_space<vmem>>, %arg7: memref<1x1x1xf32, #tpu.memory_space<vmem>>, %arg8: memref<1x16x128xf32, #tpu.memory_space<vmem>>) attributes {dimension_semantics = [#tpu.dimension_semantics<parallel>, #tpu.dimension_semantics<parallel>], iteration_bounds = array<i64: 2, 2>, scalar_prefetch = 0 : i64, scratch_operands = 0 : i64, tpu.core_type = #tpu.core_type<tc>, window_params = [{transform_indices = @transform_0, window_bounds = array<i64: 1, 16, 128>}, {pipeline_mode = #tpu.pipeline_mode<synchronous>, transform_indices = @transform_1, window_bounds = array<i64: 4, 16>}, {pipeline_mode = #tpu.pipeline_mode<synchronous>, transform_indices = @transform_2, window_bounds = array<i64: 4, 1>}, {pipeline_mode = #tpu.pipeline_mode<synchronous>, transform_indices = @transform_3, window_bounds = array<i64: 4, 1>}, {transform_indices = @transform_4, window_bounds = array<i64: 1, 16, 1>}, {transform_indices = @transform_5, window_bounds = array<i64: 1, 1, 1>}, {transform_indices = @transform_6, window_bounds = array<i64: 1, 16, 128>}]} {
    %c0 = arith.constant 0 : index
    %c0_0 = arith.constant 0 : index
    %c0_1 = arith.constant 0 : index
    %0 = vector.load %arg2[%c0, %c0_0, %c0_1] : memref<1x16x128xf32, #tpu.memory_space<vmem>>, vector<1x16x128xf32>
    %1 = vector.shape_cast %0 : vector<1x16x128xf32> to vector<16x128xf32>
    %c0_2 = arith.constant 0 : index
    %c0_3 = arith.constant 0 : index
    %2 = vector.load %arg3[%c0_2, %c0_3] : memref<4x16xf32, #tpu.memory_space<vmem>>, vector<4x16xf32>
    %cst = arith.constant dense<0.000000e+00> : vector<4x128xf32>
    %3 = tpu.matmul %2, %1, %cst {dimension_numbers = #tpu.dot_dimension_numbers<[1], [0], [0], [1], [0, 0, 1, 1], [], []>} : vector<4x16xf32>, vector<16x128xf32>, vector<4x128xf32> -> vector<4x128xf32>
    %c0_4 = arith.constant 0 : index
    %c0_5 = arith.constant 0 : index
    %4 = vector.load %arg4[%c0_4, %c0_5] : memref<4x1xf32, #tpu.memory_space<vmem>>, vector<4x1xf32>
    %5 = vector.broadcast %4 : vector<4x1xf32> to vector<4x128xf32>
    %6 = arith.addf %3, %5 : vector<4x128xf32>
    %cst_6 = arith.constant 5.000000e-01 : f32
    %7 = vector.broadcast %cst_6 : f32 to vector<4x128xf32>
    %8 = arith.mulf %7, %6 : vector<4x128xf32>
    %cst_7 = arith.constant 0.707106769 : f32
    %9 = vector.broadcast %cst_7 : f32 to vector<4x128xf32>
    %10 = arith.mulf %6, %9 : vector<4x128xf32>
    %11 = math.erf %10 : vector<4x128xf32>
    %cst_8 = arith.constant 1.000000e+00 : f32
    %12 = vector.broadcast %cst_8 : f32 to vector<4x128xf32>
    %13 = arith.addf %12, %11 : vector<4x128xf32>
    %14 = arith.mulf %8, %13 : vector<4x128xf32>
    %c0_9 = arith.constant 0 : index
    %c0_10 = arith.constant 0 : index
    %15 = vector.load %arg5[%c0_9, %c0_10] : memref<4x1xf32, #tpu.memory_space<vmem>>, vector<4x1xf32>
    %16 = vector.broadcast %15 : vector<4x1xf32> to vector<4x128xf32>
    %17 = arith.mulf %14, %16 : vector<4x128xf32>
    %cst_11 = arith.constant dense<0.000000e+00> : vector<128xf32>
    %18 = vector.multi_reduction <add>, %17, %cst_11 [0] : vector<4x128xf32> to vector<128xf32>
    %19 = vector.shape_cast %18 : vector<128xf32> to vector<1x128xf32>
    %c0_12 = arith.constant 0 : index
    %c0_13 = arith.constant 0 : index
    %c0_14 = arith.constant 0 : index
    %20 = vector.load %arg7[%c0_12, %c0_13, %c0_14] : memref<1x1x1xf32, #tpu.memory_space<vmem>>, vector<1x1x1xf32>
    %21 = vector.shape_cast %20 : vector<1x1x1xf32> to vector<1x1xf32>
    %22 = vector.broadcast %21 : vector<1x1xf32> to vector<1x128xf32>
    %23 = arith.addf %19, %22 : vector<1x128xf32>
    %24 = arith.negf %23 : vector<1x128xf32>
    %25 = math.exp %24 : vector<1x128xf32>
    %cst_15 = arith.constant 1.000000e+00 : f32
    %26 = vector.broadcast %cst_15 : f32 to vector<1x128xf32>
    %27 = arith.addf %26, %25 : vector<1x128xf32>
    %28 = arith.divf %26, %27 : vector<1x128xf32>
    %c0_16 = arith.constant 0 : index
    %c0_17 = arith.constant 0 : index
    %c0_18 = arith.constant 0 : index
    %29 = vector.load %arg6[%c0_16, %c0_17, %c0_18] : memref<1x16x1xf32, #tpu.memory_space<vmem>>, vector<1x16x1xf32>
    %30 = vector.shape_cast %29 : vector<1x16x1xf32> to vector<16x1xf32>
    %31 = vector.broadcast %30 : vector<16x1xf32> to vector<16x128xf32>
    %32 = arith.mulf %1, %31 : vector<16x128xf32>
    %33 = vector.broadcast %28 : vector<1x128xf32> to vector<16x128xf32>
    %34 = arith.mulf %32, %33 : vector<16x128xf32>
    %c0_19 = arith.constant 0 : index
    %c0_20 = arith.constant 0 : index
    %c0_21 = arith.constant 0 : index
    %35 = vector.load %arg8[%c0_19, %c0_20, %c0_21] : memref<1x16x128xf32, #tpu.memory_space<vmem>>, vector<1x16x128xf32>
    %36 = vector.shape_cast %35 : vector<1x16x128xf32> to vector<16x128xf32>
    %37 = vector.shape_cast %34 : vector<16x128xf32> to vector<1x16x128xf32>
    tpu.vector_store %arg8[%c0_19, %c0_20, %c0_21], %37 {strides = array<i32>} : memref<1x16x128xf32, #tpu.memory_space<vmem>>, vector<1x16x128xf32>,
    return
  }
  func.func @transform_0(%arg0: i32, %arg1: i32) -> (i32, i32, i32) {
    %c0_i32 = arith.constant 0 : i32
    %c0_i32_0 = arith.constant 0 : i32
    return %arg0, %c0_i32, %arg1 : i32, i32, i32
  }
  func.func @transform_1(%arg0: i32, %arg1: i32) -> (i32, i32) {
    %c0_i32 = arith.constant 0 : i32
    %c0_i32_0 = arith.constant 0 : i32
    %c0_i32_1 = arith.constant 0 : i32
    return %c0_i32, %c0_i32_0 : i32, i32
  }
  func.func @transform_2(%arg0: i32, %arg1: i32) -> (i32, i32) {
    %c0_i32 = arith.constant 0 : i32
    %c0_i32_0 = arith.constant 0 : i32
    %c0_i32_1 = arith.constant 0 : i32
    return %c0_i32, %c0_i32_0 : i32, i32
  }
  func.func @transform_3(%arg0: i32, %arg1: i32) -> (i32, i32) {
    %c0_i32 = arith.constant 0 : i32
    %c0_i32_0 = arith.constant 0 : i32
    %c0_i32_1 = arith.constant 0 : i32
    return %c0_i32, %c0_i32_0 : i32, i32
  }
  func.func @transform_4(%arg0: i32, %arg1: i32) -> (i32, i32, i32) {
    %c0_i32 = arith.constant 0 : i32
    %c0_i32_0 = arith.constant 0 : i32
    %c0_i32_1 = arith.constant 0 : i32
    return %arg0, %c0_i32, %c0_i32_0 : i32, i32, i32
  }
  func.func @transform_5(%arg0: i32, %arg1: i32) -> (i32, i32, i32) {
    %c0_i32 = arith.constant 0 : i32
    %c0_i32_0 = arith.constant 0 : i32
    %c0_i32_1 = arith.constant 0 : i32
    return %arg0, %c0_i32, %c0_i32_0 : i32, i32, i32
  }
  func.func @transform_6(%arg0: i32, %arg1: i32) -> (i32, i32, i32) {
    %c0_i32 = arith.constant 0 : i32
    %c0_i32_0 = arith.constant 0 : i32
    return %arg0, %c0_i32, %arg1 : i32, i32, i32
  }
}

</mosaic_0001>

<bundles_post_ra>
// kernel: biattn.1
= control target key start
LH: loop header
LB: loop body
LE: loop exit
PB: predicated region body
PF: predicated region fallthrough
CT: control target
= control target key end

     0   :  { %s810_s21 = smov 0   ;;  %s812_s22 = smov 0   ;;  %s927_s0 = inlined_call_operand.vmem [shape: f32[2,16,256], index: 0, kind: input, shape index: {}]   ;;  %s928_s1 = inlined_call_operand.vmem [shape: f32[4,16], index: 1, kind: input, shape index: {}]   ;;  %s929_s2 = inlined_call_operand.vmem [shape: f32[4,1], index: 2, kind: input, shape index: {}]   ;;  %s930_s3 = inlined_call_operand.vmem [shape: f32[4,1], index: 3, kind: input, shape index: {}]   ;;  %s931_s4 = inlined_call_operand.vmem [shape: f32[2,16,1], index: 4, kind: input, shape index: {}]   ;;  %s932_s5 = inlined_call_operand.vmem [shape: f32[2,1,1], index: 5, kind: input, shape index: {}]   ;;  %s933_s6 = inlined_call_operand.vmem [shape: f32[2,16,256], index: 6, kind: output, shape index: {}]  }
   0x1   :  { %s814_s23 = smov 0   ;;  %s816_s24 = smov 0  }
   0x2   :  { %s818_s25 = smov 0   ;;  %s820_s26 = smov 0  }
   0x3   :  { %s822_s27 = smov 0  }
   0x4 LB: > { %s25_s28 = sadd.s32 1, %s761_s25  ;;  %s28_s29 = sadd.s32 1, %s765_s26  ;;  %s769_s27 = sphi %s822_s27, %s16_s27   ;;  %s765_s26 = sphi %s820_s26, %s940_s26   ;;  %s761_s25 = sphi %s818_s25, %s939_s25   ;;  %s757_s24 = sphi %s816_s24, %s938_s24   ;;  %s753_s23 = sphi %s814_s23, %s937_s23   ;;  %s749_s22 = sphi %s812_s22, %s936_s22   ;;  %s745_s21 = sphi %s810_s21, %s935_s21  }
   0x5   : > { %p26_p0 = scmp.ge.s32.totalorder %s25_s28, 2  ;;  %s614_s30 = sadd.s32 4294967295, %s769_s27  }
   0x6   : > { %p44_p1 = scmp.ne.s32.totalorder %s749_s22, %s745_s21  ;;  %p45_p2 = scmp.eq.s32.totalorder %s769_s27, 0 }
   0x7   : > { %s942_s28 = smov (%p26_p0, %s25_s28), 0  ;;  %s944_s29 = smov (!%p26_p0, %s28_s29), %s765_s26 }
   0x8   : > { %p30_p3 = scmp.ge.s32.totalorder %s944_s29, 2  ;;  %p191_p4 = scmp.eq.s32.totalorder %s614_s30, 3 }
   0x9   : > { %s33_s7 = ssub.s32 %s761_s25, %s942_s28  ;;  %p46_p5 = por %p45_p2, %p44_p1 }
   0xa   : > { %s946_s29 = smov (%p30_p3, %s944_s29), 0  ;;  %p858_p6 = por %p191_p4, %p44_p1 }
   0xb   : > { %s32_s9 = ssub.s32 %s765_s26, %s946_s29  ;;  %s37_s11 = sadd.s32 1, %s749_s22 }
   0xc   : > { %s34_s10 = sor.u32 %s33_s7, %s32_s9  ;;  %p617_p8 = scmp.ge.s32.totalorder %s769_s27, 4 }
   0xd   : > { %p35_p7 = scmp.eq.s32.totalorder %s34_s10, 0 }
   0xe   : > { %222 = sbr.rel (%p617_p8) target bundleno = 28 (0x1c), region = 28 }
   0xf   : > { %s866_s12 = scalar_select %p35_p7, %s749_s22, %s37_s11  }
  0x15   : > { %225 = sbr.rel (!%p46_p5) target bundleno = 28 (0x1c), region = 32  ;;  %s227_s13 = sand.u32 (%p46_p5), 1, %s749_s22  }
  0x16   : > { %s619_s14 = sshll.u32 (%p46_p5), %s765_s26, 2  ;;  %s618_s15 = sshll.u32 (%p46_p5), %s227_s13, 4 }
  0x17   : > { %s231_s16 = sadd.s32 (%p46_p5), %s761_s25, %s619_s14  ;;  %s229_s30 = scalar_lea.vmem (%p46_p5), [#allocation2], %s618_s15 }
  0x18   : > { %s620_s17 = sshll.u32 (%p46_p5), %s231_s16, 3 }
  0x19   : > { %s233_s20 = scalar_lea.vmem (%p46_p5), %s927_s0, %s620_s17 }
  0x1a   : > { %v263_v0 = vld [vmem:[%s233_s20] sm:$0xff] (%p46_p5)  ;;  %v265_v1 = vld [vmem:[%s233_s20 + $0x10] sm:$0xff] (%p46_p5) }
  0x1b   : > { %264 = vst [vmem:[%s229_s30] sm:$0xff] (%p46_p5), %v263_v0  ;;  %266 = vst [vmem:[%s229_s30 + $0x8] sm:$0xff] (%p46_p5), %v265_v1 }
  0x1c PF: > { %p621_p9 = scmp.ge.s32.totalorder %s769_s27, 1  ;;  %p285_p10 = scmp.lt.s32.totalorder %s769_s27, 5 }
  0x1e   : > { %p286_p11 = pnand %p621_p9, %p285_p10 }
  0x1f   : > { %s292_s7 = sand.u32 (!%p286_p11), 1, %s745_s21   ;;  %v771_v2 = vmov (!%p286_p11), 0.0|0.0   ;;  %vm772_vm0 = vmmov (!%p286_p11), 0   ;;  %v773_v3 = vmov (!%p286_p11), 0.0   ;;  %v339_v4 = vld [vmem:[%s929_s2] sm:$0xf] (!%p286_p11)  ;;  %v445_v24 = vlaneseq (!%p286_p11) }
  0x20   : > { %289 = sbr.rel (%p286_p11) target bundleno = 325 (0x145), region = 78  ;;  %644 = vmatprep.subr.bf16.mxu0 (!%p286_p11), %v771_v2  ;;  %s878_s9 = sshll.u32 (!%p286_p11), %s292_s7, 4  ;;  %641 = vmatprep.mubr.msk.f32.mxu0 (!%p286_p11), %vm772_vm0, %v773_v3  ;;  %v774_v5 = vmov (!%p286_p11), 0   ;;  %v424_v9 = vld [vmem:[%s930_s3] sm:$0xf] (!%p286_p11)  ;;  %vm345_vm1 = vcmask (!%p286_p11), 130048  }
  0x21   : > { %p328_p12 = scmp.lt.s32.totalorder (!%p286_p11), %s757_s24, 1  ;;  %707 = vset.pattern.permute.xlu0 (!%p286_p11), %v774_v5  ;;  %708 = vset.pattern.permute.xlu1 (!%p286_p11), %v774_v5  ;;  %s294_s13 = scalar_lea.vmem (!%p286_p11), [#allocation2], %s878_s9  ;;  %v338_v10 = vld [vmem:[%s928_s1] sm:$0xf] (!%p286_p11)  ;;  %vm431_vm2 = vcmask (!%p286_p11), 1043456   ;;  %v446_v28 = vshrl.u32 (!%p286_p11), %v445_v24, 7 }
  0x22   : > { %v336_v6 = vld [vmem:[%s294_s13] sm:$0xff] (!%p286_p11)  ;;  %v337_v7 = vld [vmem:[%s294_s13 + $0x8] sm:$0xff] (!%p286_p11)  ;;  %342 = vperm.xlu0 (!%p286_p11), %707, %v339_v4   ;;  %s327_s13 = scalar_lea.vmem (!%p286_p11), [#allocation3], %s878_s9 }
  0x23   : > { %v645_v8 = vpack.c.bf16 (!%p286_p11), %v337_v7, %v336_v6  ;;  %v447_v30 = vsub.s32 (!%p286_p11), 0, %v446_v28 }
  0x25   : > { %646 = vmatpush3.bf16.msra.mxu0 (!%p286_p11), %v645_v8 }
  0x26   : > { %427 = vperm.xlu0 (!%p286_p11), %707, %v424_v9  }
  0x27   : > { %s329_s21 = scalar_select %p328_p12, %s757_s24, 1 }
  0x28   : > { %642 = vmatmul.mubr.msk.f32.vlgmr.msra.gmra.mrb[0].mxu0 %vm345_vm1, %v338_v10 }
  0x29   : > { %s633_s16 = sshll.u32 %s329_s21, 4  ;;  %s335_s19 = scalar_lea.vmem %s932_s5, %s329_s21 }
  0x2a   : > { %s332_s11 = scalar_lea.vmem %s931_s4, %s633_s16  ;;  %v439_v11 = vld [vmem:[%s335_s19] sm:$0x1]  ;;  %s629_s21 = sshll.u32 (%p858_p6), %s757_s24, 2 }
  0x2b   : > { %442 = vperm.xlu1 %708, %v439_v11   ;;  %v457_v12 = vld [vmem:[%s332_s11 + $0x8] sm:$0xff]  ;;  %v456_v13 = vld [vmem:[%s332_s11] sm:$0xff]  ;;  %s482_s14 = sadd.s32 (%p858_p6), %s753_s23, %s629_s21 }
  0x2c   : > { %465 = vperm.xlu0 %707, %v457_v12   ;;  %s630_s15 = sshll.u32 (%p858_p6), %s482_s14, 3 }
  0x2d   : > { %s484_s18 = scalar_lea.vmem (%p858_p6), %s933_s6, %s630_s15 }
  0x2f   : > { %460 = vperm.xlu1 %708, %v456_v13  }
  0xa1   : > { %v343_v14 = vpop.permute.xlu0 %342 }
  0xa5   : > { %v428_v23 = vpop.permute.xlu0 %427 }
  0xaa   : > { %v443_v33 = vpop.permute.xlu1 %442 }
  0xab   : > { %v448_v35 = vrot.slane %v443_v33, %v447_v30  ;;  %v466_v41 = vpop.permute.xlu0 %465 }
  0xac   : > { %v469_v43 = vmul.f32 %v466_v41, %v337_v7 }
  0xae   : > { %v461_v42 = vpop.permute.xlu1 %460 }
  0xaf   : > { %v468_v44 = vmul.f32 %v461_v42, %v336_v6 }
  0xfb   : > { %v415_v15 = vpop.f32.mrb[0].mxu0 }
  0xfc   : > { %v416_v16 = vadd.f32 %v415_v15, %v343_v14  ;;  %v643_v17 = vpop.f32.mrb[1].mxu0 }
  0xfe   : > { %v420_v18 = vmul.f32 0.70710677, %v416_v16  ;;  %v419_v20 = vmul.f32 0.5, %v416_v16 }
 0x100   : > { %709 = verf.f32 %v420_v18 }
 0x10a   : > { %v710_v19 = vpop.eup %709 }
 0x10b   : > { %v422_v21 = vadd.f32 1.0, %v710_v19 }
 0x10d   : > { %v423_v22 = vmul.f32 %v422_v21, %v419_v20 }
 0x10f   : > { %v430_v25 = vmul.f32 %v428_v23, %v423_v22 }
 0x111   : > { %v432_v26 = vsel %vm431_vm2, %v430_v25, 0.0 }
 0x112   : > { %v433_v27 = vrot.slane %v432_v26, 4 }
 0x114   : > { %v434_v29 = vadd.f32 %v433_v27, %v432_v26 }
 0x116   : > { %v435_v31 = vrot.slane %v434_v29, 2 }
 0x118   : > { %v436_v32 = vadd.f32 %v435_v31, %v434_v29 }
 0x11a   : > { %v437_v34 = vrot.slane %v436_v32, 1 }
 0x11c   : > { %v438_v36 = vadd.f32 %v437_v34, %v436_v32 }
 0x11e   : > { %v449_v37 = vadd.f32 %v448_v35, %v438_v36 }
 0x120   : > { %v627_v38 = vmul.f32 -1.442695, %v449_v37 }
 0x122   : > { %711 = vpow2.f32 %v627_v38 }
 0x12c   : > { %v712_v39 = vpop.eup %711 }
 0x12d   : > { %v453_v40 = vadd.f32 1.0, %v712_v39 }
 0x12f   : > { %713 = vrcp.f32 %v453_v40 }
 0x136   : > { %480 = sbr.rel (!%p858_p6) target bundleno = 325 (0x145), region = 86 }
 0x139   : > { %v714_v45 = vpop.eup %713 }
 0x13a   : > { %v470_v46 = vmul.f32 %v714_v45, %v468_v44  ;;  %v471_v47 = vmul.f32 %v714_v45, %v469_v43 }
 0x13c   : > { %472 = vst [vmem:[%s327_s13] sm:$0xff] %v470_v46  ;;  %473 = vst [vmem:[%s327_s13 + $0x8] sm:$0xff] %v471_v47 }
 0x143   : > { %v514_v48 = vld [vmem:[%s327_s13] sm:$0xff]  ;;  %v516_v49 = vld [vmem:[%s327_s13 + $0x8] sm:$0xff] }
 0x144   : > { %515 = vst [vmem:[%s484_s18] sm:$0xff] %v514_v48  ;;  %517 = vst [vmem:[%s484_s18 + $0x10] sm:$0xff] %v516_v49 }
 0x145 PF: > { %s16_s27 = sadd.s32 1, %s769_s27   ;;  %s935_s21 = smov %s749_s22 }
 0x146   : > { %p13_p13 = scmp.ge.s32.totalorder %s16_s27, 6   ;;  %s936_s22 = smov %s866_s12 }
 0x147   : > { %s937_s23 = smov %s761_s25  ;;  %s938_s24 = smov %s765_s26 }
 0x148   : > { %s939_s25 = smov %s942_s28  ;;  %s940_s26 = smov %s946_s29 }
 0x149   :  { %15 = sbr.rel (!%p13_p13) target bundleno = 4 (0x4), region = 161 }

</bundles_post_ra>
